<compile_context>
chip_gen: v7x
topology: tpu7x:2x2x1
jax: 0.10.0
libtpu: 0.0.40
codegen_flags: <defaults>
</compile_context>

<pallas_src>
import jax
import jax.numpy as jnp
from jax.experimental import pallas as pl
from jax.experimental.pallas import tpu as pltpu

HIDDEN = 64   # Qnet hidden width (fixed by the PyTorch module)
LANE = 128    # TPU lane width -- hidden/action dims are padded to this


def _round_up(n, m):
    return ((n + m - 1) // m) * m


def qnet_kernel(x_ref, w_ref, b_ref, ot_ref):
    """Fused 3-layer MLP on one batch tile, transposed (batch-on-lanes) output.

    x_ref:  [TB, n_obs]             f32   (raw, unpadded input tile)
    w_ref:  [obs_pad + 2*L, L]      bf16  (w1 | w2 | w3 stacked along rows)
    b_ref:  [3, L]                  f32   (b1 ; b2 ; b3)
    ot_ref: [n_actions, TB]         f32   (lane-dense transposed Q-values)
    """
    n_obs = x_ref.shape[1]
    lanes = w_ref.shape[1]
    obs_pad = w_ref.shape[0] - 2 * lanes
    n_actions = ot_ref.shape[0]

    # In-kernel cast; no wrapper-side pad/cast pass over x.
    x = x_ref[...].astype(jnp.bfloat16)                     # [TB, n_obs]
    w1 = w_ref[0:n_obs, :]                                  # [n_obs, L]   bf16
    w2 = w_ref[obs_pad:obs_pad + lanes, :]                  # [L, L]       bf16
    w3 = w_ref[obs_pad + lanes:obs_pad + 2 * lanes, :]      # [L, L]       bf16

    # Matmuls on the MXU (bf16 in, f32 accumulate); bias + ReLU epilogue in f32.
    h1 = jnp.dot(x, w1, preferred_element_type=jnp.float32) + b_ref[0:1, :]
    h1 = jnp.maximum(h1, 0.0).astype(jnp.bfloat16)
    h2 = jnp.dot(h1, w2, preferred_element_type=jnp.float32) + b_ref[1:2, :]
    h2 = jnp.maximum(h2, 0.0).astype(jnp.bfloat16)
    out = jnp.dot(h2, w3, preferred_element_type=jnp.float32) + b_ref[2:3, :]

    # Re-orient to batch-on-lanes: full-tile XLU transpose (both dims are
    # 128-multiples), then keep only the real action rows for the store.
    out_t = jnp.transpose(out)                              # [L, TB]
    ot_ref[...] = out_t[0:n_actions, :].astype(ot_ref.dtype)


def init_qnet_params(key, n_observations, n_actions, hidden=HIDDEN):
    """Deterministic init matching nn.Linear's U(-1/sqrt(fan_in), 1/sqrt(fan_in)).

    Weights are stored as [in, out] (transposed vs. PyTorch's [out, in]) so the
    forward pass is y = x @ W + b.  Biases are [1, out].
    """
    def linear(key, fan_in, fan_out):
        kw, kb = jax.random.split(key)
        bound = 1.0 / jnp.sqrt(jnp.float32(fan_in))
        w = jax.random.uniform(kw, (fan_in, fan_out), jnp.float32, -bound, bound)
        b = jax.random.uniform(kb, (1, fan_out), jnp.float32, -bound, bound)
        return w, b

    k1, k2, k3 = jax.random.split(key, 3)
    w1, b1 = linear(k1, n_observations, hidden)
    w2, b2 = linear(k2, hidden, hidden)
    w3, b3 = linear(k3, hidden, n_actions)
    return {"w1": w1, "b1": b1, "w2": w2, "b2": b2, "w3": w3, "b3": b3}


def pack_qnet_params(params, n_observations, n_actions):
    """Pack (w1,b1,w2,b2,w3,b3) into one bf16 weight slab + one f32 bias block.

    Do this once (e.g. after each target-network sync); the packed buffers are
    what the kernel consumes every forward call.  Padding is exact: padded
    weight rows/cols and bias lanes are 0, so padded activations stay 0 through
    ReLU and never contribute to the real outputs.
    """
    lanes = max(LANE, _round_up(n_actions, LANE), _round_up(HIDDEN, LANE))
    obs_pad = _round_up(n_observations, 8)

    def pad2(a, rows, cols):
        return jnp.pad(a, ((0, rows - a.shape[0]), (0, cols - a.shape[1])))

    w_pack = jnp.concatenate(
        [pad2(params["w1"], obs_pad, lanes),   # [obs_pad, L]
         pad2(params["w2"], lanes, lanes),     # [L, L]
         pad2(params["w3"], lanes, lanes)],    # [L, L]
        axis=0).astype(jnp.bfloat16)
    b_pack = jnp.concatenate(
        [pad2(params["b1"], 1, lanes),
         pad2(params["b2"], 1, lanes),
         pad2(params["b3"], 1, lanes)],
        axis=0).astype(jnp.float32)            # [3, L]

    return {"w_pack": w_pack, "b_pack": b_pack,
            "n_observations": n_observations, "n_actions": n_actions,
            "obs_pad": obs_pad, "lanes": lanes}


def qnet_forward_t(x, packed, *, block_b=2048):
    """Q-values transposed: returns [n_actions, B] (lane-dense, no padding).

    x: [B, n_observations] f32 (unpadded).  packed: output of pack_qnet_params.
    """
    w_pack, b_pack = packed["w_pack"], packed["b_pack"]
    lanes = packed["lanes"]
    n_actions = packed["n_actions"]
    B, n_obs = x.shape
    assert n_obs == packed["n_observations"]

    # Batch tile: multiple of 128 (keeps the in-kernel transpose and the
    # transposed output block lane-aligned).  For B > 128 make sure the grid
    # has >= 2 steps so both v7x TensorCores get work.
    tb = min(block_b, _round_up(B, LANE))
    if B > LANE:
        tb = min(tb, _round_up(pl.cdiv(B, 2), LANE))
    grid = (pl.cdiv(B, tb),)
    w_rows = w_pack.shape[0]

    flops = 2 * B * (n_obs * lanes + 2 * lanes * lanes)
    bytes_accessed = (x.size * 4 + w_pack.size * 2 + b_pack.size * 4
                      + n_actions * B * 4)

    out_t = pl.pallas_call(
        qnet_kernel,
        out_shape=jax.ShapeDtypeStruct((n_actions, B), jnp.float32),
        grid_spec=pltpu.PrefetchScalarGridSpec(
            num_scalar_prefetch=0,
            grid=grid,
            in_specs=[
                pl.BlockSpec((tb, n_obs), lambda i: (i, 0)),     # x: walks batch
                pl.BlockSpec((w_rows, lanes), lambda i: (0, 0)), # weights: resident
                pl.BlockSpec((3, lanes), lambda i: (0, 0)),      # biases: resident
            ],
            out_specs=pl.BlockSpec((n_actions, tb), lambda i: (0, i)),
        ),
        compiler_params=pltpu.CompilerParams(
            dimension_semantics=("parallel",)),
        cost_estimate=pl.CostEstimate(
            flops=flops, transcendentals=0, bytes_accessed=bytes_accessed),
    )(x, w_pack, b_pack)
    return out_t


def qnet_forward(x, packed, *, block_b=2048):
    """PyTorch-compatible forward: x [B, n_obs] f32 -> Q-values [B, n_actions]."""
    return qnet_forward_t(x, packed, block_b=block_b).T


def qnet_reference_f32(x, params):
    """Pure-JAX f32 reference (semantic check vs. the PyTorch module)."""
    h = jnp.maximum(x @ params["w1"] + params["b1"], 0.0)
    h = jnp.maximum(h @ params["w2"] + params["b2"], 0.0)
    return h @ params["w3"] + params["b3"]


def qnet_reference_bf16(x, params):
    """Pure-JAX reference with the same bf16-in / f32-accumulate numerics."""
    def layer(h, w, b):
        return jnp.dot(h.astype(jnp.bfloat16), w.astype(jnp.bfloat16),
                       preferred_element_type=jnp.float32) + b
    h = jnp.maximum(layer(x, params["w1"], params["b1"]), 0.0)
    h = jnp.maximum(layer(h, params["w2"], params["b2"]), 0.0)
    return layer(h, params["w3"], params["b3"])


if __name__ == "__main__":
    key = jax.random.PRNGKey(0)
    k_params, k_x1, k_x2 = jax.random.split(key, 3)

    n_observations, n_actions = 4, 2
    params = init_qnet_params(k_params, n_observations, n_actions)
    packed = pack_qnet_params(params, n_observations, n_actions)

    # Two batch sizes: tiny (single partial block) and one that exercises a
    # 2-step grid with a partial last block.
    for batch, kx in ((8, k_x1), (300, k_x2)):
        x = jax.random.normal(kx, (batch, n_observations), jnp.float32)
        out = jax.block_until_ready(qnet_forward(x, packed))
        assert out.shape == (batch, n_actions)

        # Tight check vs. a reference with identical bf16/f32-accum numerics.
        ref_bf16 = qnet_reference_bf16(x, params)
        assert jnp.allclose(out, ref_bf16, atol=2e-3, rtol=2e-3), (
            batch, float(jnp.max(jnp.abs(out - ref_bf16))))
        # Loose semantic check vs. the full-f32 PyTorch-equivalent forward.
        ref_f32 = qnet_reference_f32(x, params)
        assert jnp.allclose(out, ref_f32, atol=1e-1, rtol=1e-1), (
            batch, float(jnp.max(jnp.abs(out - ref_f32))))

    print("KERNEL_OK")
</pallas_src>

<mosaic_0001>
module attributes {stable_mosaic.version = 11 : i64} {
  func.func @qnet_kernel(%arg0: i32, %arg1: memref<128x4xf32, #tpu.memory_space<vmem>>, %arg2: memref<264x128xbf16, #tpu.memory_space<vmem>>, %arg3: memref<3x128xf32, #tpu.memory_space<vmem>>, %arg4: memref<2x128xf32, #tpu.memory_space<vmem>>) attributes {dimension_semantics = [#tpu.dimension_semantics<parallel>], iteration_bounds = array<i64: 1>, scalar_prefetch = 0 : i64, scratch_operands = 0 : i64, tpu.core_type = #tpu.core_type<tc>, window_params = [{transform_indices = @transform_0, window_bounds = array<i64: 128, 4>}, {pipeline_mode = #tpu.pipeline_mode<synchronous>, transform_indices = @transform_1, window_bounds = array<i64: 264, 128>}, {pipeline_mode = #tpu.pipeline_mode<synchronous>, transform_indices = @transform_2, window_bounds = array<i64: 3, 128>}, {transform_indices = @transform_3, window_bounds = array<i64: 2, 128>}]} {
    %c0 = arith.constant 0 : index
    %c0_0 = arith.constant 0 : index
    %0 = vector.load %arg1[%c0, %c0_0] : memref<128x4xf32, #tpu.memory_space<vmem>>, vector<128x4xf32>
    %1 = arith.truncf %0 : vector<128x4xf32> to vector<128x4xbf16>
    %c0_1 = arith.constant 0 : index
    %c0_2 = arith.constant 0 : index
    %2 = vector.load %arg2[%c0_1, %c0_2] : memref<264x128xbf16, #tpu.memory_space<vmem>>, vector<4x128xbf16>
    %c8 = arith.constant 8 : index
    %c0_3 = arith.constant 0 : index
    %3 = vector.load %arg2[%c8, %c0_3] : memref<264x128xbf16, #tpu.memory_space<vmem>>, vector<128x128xbf16>
    %c136 = arith.constant 136 : index
    %c0_4 = arith.constant 0 : index
    %4 = vector.load %arg2[%c136, %c0_4] : memref<264x128xbf16, #tpu.memory_space<vmem>>, vector<128x128xbf16>
    %cst = arith.constant dense<0.000000e+00> : vector<128x128xf32>
    %5 = tpu.matmul %1, %2, %cst {dimension_numbers = #tpu.dot_dimension_numbers<[1], [0], [0], [1], [0, 0, 1, 1], [], []>} : vector<128x4xbf16>, vector<4x128xbf16>, vector<128x128xf32> -> vector<128x128xf32>
    %c0_5 = arith.constant 0 : index
    %c0_6 = arith.constant 0 : index
    %6 = vector.load %arg3[%c0_5, %c0_6] : memref<3x128xf32, #tpu.memory_space<vmem>>, vector<1x128xf32>
    %7 = vector.broadcast %6 : vector<1x128xf32> to vector<128x128xf32>
    %8 = arith.addf %5, %7 : vector<128x128xf32>
    %cst_7 = arith.constant 0.000000e+00 : f32
    %9 = vector.broadcast %cst_7 : f32 to vector<128x128xf32>
    %10 = arith.maximumf %8, %9 : vector<128x128xf32>
    %11 = arith.truncf %10 : vector<128x128xf32> to vector<128x128xbf16>
    %cst_8 = arith.constant dense<0.000000e+00> : vector<128x128xf32>
    %12 = tpu.matmul %11, %3, %cst_8 {dimension_numbers = #tpu.dot_dimension_numbers<[1], [0], [0], [1], [0, 0, 1, 1], [], []>} : vector<128x128xbf16>, vector<128x128xbf16>, vector<128x128xf32> -> vector<128x128xf32>
    %c1 = arith.constant 1 : index
    %c0_9 = arith.constant 0 : index
    %13 = vector.load %arg3[%c1, %c0_9] : memref<3x128xf32, #tpu.memory_space<vmem>>, vector<1x128xf32>
    %14 = vector.broadcast %13 : vector<1x128xf32> to vector<128x128xf32>
    %15 = arith.addf %12, %14 : vector<128x128xf32>
    %cst_10 = arith.constant 0.000000e+00 : f32
    %16 = vector.broadcast %cst_10 : f32 to vector<128x128xf32>
    %17 = arith.maximumf %15, %16 : vector<128x128xf32>
    %18 = arith.truncf %17 : vector<128x128xf32> to vector<128x128xbf16>
    %cst_11 = arith.constant dense<0.000000e+00> : vector<128x128xf32>
    %19 = tpu.matmul %18, %4, %cst_11 {dimension_numbers = #tpu.dot_dimension_numbers<[1], [0], [0], [1], [0, 0, 1, 1], [], []>} : vector<128x128xbf16>, vector<128x128xbf16>, vector<128x128xf32> -> vector<128x128xf32>
    %c2 = arith.constant 2 : index
    %c0_12 = arith.constant 0 : index
    %20 = vector.load %arg3[%c2, %c0_12] : memref<3x128xf32, #tpu.memory_space<vmem>>, vector<1x128xf32>
    %21 = vector.broadcast %20 : vector<1x128xf32> to vector<128x128xf32>
    %22 = arith.addf %19, %21 : vector<128x128xf32>
    %23 = tpu.transpose %22, [1, 0] : vector<128x128xf32> -> vector<128x128xf32>
    %24 = vector.extract_strided_slice %23 {offsets = [0, 0], sizes = [2, 128], strides = [1, 1]} : vector<128x128xf32> to vector<2x128xf32>
    %c0_13 = arith.constant 0 : index
    %c0_14 = arith.constant 0 : index
    %25 = vector.load %arg4[%c0_13, %c0_14] : memref<2x128xf32, #tpu.memory_space<vmem>>, vector<2x128xf32>
    tpu.vector_store %arg4[%c0_13, %c0_14], %24 {strides = array<i32>} : memref<2x128xf32, #tpu.memory_space<vmem>>, vector<2x128xf32>,
    return
  }
  func.func @transform_0(%arg0: i32) -> (i32, i32) {
    %c0_i32 = arith.constant 0 : i32
    %c0_i32_0 = arith.constant 0 : i32
    return %arg0, %c0_i32 : i32, i32
  }
  func.func @transform_1(%arg0: i32) -> (i32, i32) {
    %c0_i32 = arith.constant 0 : i32
    %c0_i32_0 = arith.constant 0 : i32
    %c0_i32_1 = arith.constant 0 : i32
    return %c0_i32, %c0_i32_0 : i32, i32
  }
  func.func @transform_2(%arg0: i32) -> (i32, i32) {
    %c0_i32 = arith.constant 0 : i32
    %c0_i32_0 = arith.constant 0 : i32
    %c0_i32_1 = arith.constant 0 : i32
    return %c0_i32, %c0_i32_0 : i32, i32
  }
  func.func @transform_3(%arg0: i32) -> (i32, i32) {
    %c0_i32 = arith.constant 0 : i32
    %c0_i32_0 = arith.constant 0 : i32
    return %c0_i32, %arg0 : i32, i32
  }
}

</mosaic_0001>

<bundles_post_ra>
// kernel: tpu_custom_call.1
= control target key start
LH: loop header
LB: loop body
LE: loop exit
PB: predicated region body
PF: predicated region fallthrough
CT: control target
= control target key end

     0   :  { %8 = vsyncpa [#allocation3], 0  ;;  %s946_s0 = inlined_call_operand.vmem [shape: f32[8,4], index: 0, kind: input, shape index: {}]   ;;  %s947_s1 = inlined_call_operand.hbm [shape: bf16[264,128], index: 1, kind: input, shape index: {}]   ;;  %s948_s2 = inlined_call_operand.vmem [shape: f32[3,128], index: 2, kind: input, shape index: {}]   ;;  %s949_s3 = inlined_call_operand.hbm [shape: f32[2,8], index: 3, kind: output, shape index: {}]  }
   0x1   :  { %9 = vsyncpa [#allocation4], 0  ;;  %s833_s12 = smov [#allocation2]   ;;  %s785_s16 = scalar_lea.hbm %s947_s1, 2112 }
   0x2   :  { %s17_s13 = sshll.u32 %s833_s12, 4  ;;  %p786_p0 = scmp.ne.s32.totalorder %s947_s1, %s785_s16  ;;  %s18_s13 = int_to_ptr.vmem [resolvable:$true] %s17_s13 }
   0x3   :  { %p789_p1 = scmp.lt.u32.totalorder %s785_s16, %s947_s1 }
   0x5   :  { %p791_p2 = pnand %p789_p1, %p786_p0 }
   0x7   :  { %794 = shalt.err (!%p791_p2)
}
   0x8   :  { %s795_s21 = scalar_lea.vmem %s18_s13, 2112  ;;  %p800_p4 = scmp.lt.s32.totalorder %s18_s13, %s18_s13 }
   0x9   :  { %p796_p3 = scmp.ne.s32.totalorder %s18_s13, %s795_s21  ;;  %p801_p5 = scmp.lt.s32.totalorder %s795_s21, %s795_s21 }
   0xb   :  { %p802_p6 = por %p801_p5, %p800_p4 }
   0xd   :  { %p803_p7 = pnand %p802_p6, %p796_p3 }
   0xf   :  { %806 = shalt.err (!%p803_p7)
}
  0x10   :  { %s834_s22 = smov 64   ;;  %s835_s23 = smov 4  }
  0x11   :  { %23 = dma.hbm_to_vmem [thread:$0]  %s947_s1, 2112, %s18_s13, [#allocation3], %s834_s22, %s834_s22, %s835_s23  }
  0x12   :  { %829 = dma.done.wait [#allocation3], 2112  }
  0x13   :  { %830 = vsyncadd [#allocation3], 4294965184  ;;  %vm117_vm0 = vcmask 1041408   ;;  %v54_v0 = vld [vmem:[#allocation2] sm:$0x3]  ;;  %v30_v1 = vld [vmem:[%s946_s0] sm:$0xff] }
  0x14   :  { %v31_v2 = vld [vmem:[%s946_s0 + $0x8] sm:$0xff]  ;;  %vm92_vm1 = vcmask 31744   ;;  %764 = vmatprep.subr.msk.bf16.mxu0 %vm117_vm0, %v54_v0  ;;  %v119_v3 = vsel %vm117_vm0, %v54_v0, 0  ;;  %v32_v5 = vld [vmem:[%s946_s0 + $0x10] sm:$0xff]  ;;  %v33_v6 = vld [vmem:[%s946_s0 + $0x18] sm:$0xff] }
  0x15   :  { %v46_v4 = vpack.c.bf16 %v31_v2, %v30_v1  ;;  %v34_v7 = vld [vmem:[%s946_s0 + $0x20] sm:$0xff]  ;;  %683 = vmatpush3.bf16.msra.mxu0 %v119_v3  ;;  %v47_v8 = vpack.c.bf16 %v33_v6, %v32_v5  ;;  %v35_v9 = vld [vmem:[%s946_s0 + $0x28] sm:$0xff]  ;;  %v36_v11 = vld [vmem:[%s946_s0 + $0x30] sm:$0xff] }
  0x16   :  { %v48_v10 = vpack.c.bf16 %v35_v9, %v34_v7  ;;  %v37_v12 = vld [vmem:[%s946_s0 + $0x38] sm:$0xff]  ;;  %v38_v13 = vld [vmem:[%s946_s0 + $0x40] sm:$0xff]  ;;  %v39_v14 = vld [vmem:[%s946_s0 + $0x48] sm:$0xff] }
  0x17   :  { %684 = vmatprep.mubr.msk.bf16.mxu0 %vm92_vm1, %v46_v4  ;;  %v769_v15 = vld [vmem:[#allocation2 + $0x4] sm:$0xff]   ;;  %v770_v16 = vld [vmem:[#allocation2 + $0xc] sm:$0xff]   ;;  %v49_v17 = vpack.c.bf16 %v37_v12, %v36_v11  ;;  %v50_v18 = vpack.c.bf16 %v39_v14, %v38_v13  ;;  %v771_v19 = vld [vmem:[#allocation2 + $0x14] sm:$0xff]  }
  0x18   :  { %685 = vmatmul.mubr.msk.bf16.vlgmr.msra.gmra.mrb[0].mxu0 %vm92_vm1, %v47_v8  ;;  %700 = vmatprep.subr.bf16.mxu1 %v769_v15  ;;  %v40_v20 = vld [vmem:[%s946_s0 + $0x50] sm:$0xff]  ;;  %v41_v21 = vld [vmem:[%s946_s0 + $0x58] sm:$0xff]  ;;  %v772_v22 = vld [vmem:[#allocation2 + $0x1c] sm:$0xff]  }
  0x19   :  { %688 = vmatprep.mubr.msk.bf16.mxu0 %vm92_vm1, %v48_v10  ;;  %701 = vmatpush3.bf16.msra.mxu1 %v769_v15  ;;  %v42_v23 = vld [vmem:[%s946_s0 + $0x60] sm:$0xff]  ;;  %v43_v24 = vld [vmem:[%s946_s0 + $0x68] sm:$0xff]  ;;  %v51_v25 = vpack.c.bf16 %v41_v21, %v40_v20  ;;  %v44_v28 = vld [vmem:[%s946_s0 + $0x70] sm:$0xff] }
  0x1a   :  { %702 = vmatprep.subr.bf16.mxu1 %v770_v16  ;;  %v52_v26 = vpack.c.bf16 %v43_v24, %v42_v23  ;;  %v773_v27 = vld [vmem:[#allocation2 + $0x24] sm:$0xff]   ;;  %v45_v29 = vld [vmem:[%s946_s0 + $0x78] sm:$0xff]  ;;  %v776_v33 = vld [vmem:[#allocation2 + $0x3c] sm:$0xff]  }
  0x1b   :  { %v774_v30 = vld [vmem:[#allocation2 + $0x2c] sm:$0xff]   ;;  %v53_v31 = vpack.c.bf16 %v45_v29, %v44_v28  ;;  %v775_v32 = vld [vmem:[#allocation2 + $0x34] sm:$0xff]   ;;  %v777_v34 = vld [vmem:[#allocation2 + $0x44] sm:$0xff]  }
  0x1c   :  { %v778_v35 = vld [vmem:[#allocation2 + $0x4c] sm:$0xff]   ;;  %732 = vmatprep.subr.bf16.mxu0 %v777_v34  ;;  %v779_v36 = vld [vmem:[#allocation2 + $0x54] sm:$0xff]   ;;  %v780_v37 = vld [vmem:[#allocation2 + $0x5c] sm:$0xff]  }
  0x1d   :  { %703 = vmatpush3.bf16.msra.mxu1 %v770_v16  ;;  %733 = vmatpush3.bf16.msra.mxu0 %v777_v34  ;;  %v781_v38 = vld [vmem:[#allocation2 + $0x64] sm:$0xff]   ;;  %v782_v39 = vld [vmem:[#allocation2 + $0x6c] sm:$0xff]   ;;  %v614_v40 = vld [vmem:[%s948_s2] ss:$0 sm:$0xff] }
  0x1e   :  { %704 = vmatprep.subr.bf16.mxu1 %v771_v19  ;;  %734 = vmatprep.subr.bf16.mxu0 %v778_v35  ;;  %v784_v34 = vld [vmem:[#allocation2 + $0x7c] sm:$0xff]  }
  0x20   :  { %689 = vmatmul.mubr.msk.bf16.gmra.mrb[4].mxu0 %vm92_vm1, %v49_v17 }
  0x21   :  { %692 = vmatprep.mubr.msk.bf16.mxu0 %vm92_vm1, %v50_v18  ;;  %705 = vmatpush3.bf16.msra.mxu1 %v771_v19 }
  0x22   :  { %706 = vmatprep.subr.bf16.mxu1 %v772_v22  ;;  %735 = vmatpush3.bf16.msra.mxu0 %v778_v35  ;;  %v623_v35 = vld [vmem:[%s948_s2 + $0x1] ss:$0 sm:$0xff] }
  0x23   :  { %736 = vmatprep.subr.bf16.mxu0 %v779_v36 }
  0x25   :  { %707 = vmatpush3.bf16.msra.mxu1 %v772_v22 }
  0x26   :  { %708 = vmatprep.subr.bf16.mxu1 %v773_v27  ;;  %737 = vmatpush3.bf16.msra.mxu0 %v779_v36 }
  0x27   :  { %738 = vmatprep.subr.bf16.mxu0 %v780_v37 }
  0x28   :  { %693 = vmatmul.mubr.msk.bf16.gmra.mrb[8].mxu0 %vm92_vm1, %v51_v25 }
  0x29   :  { %696 = vmatprep.mubr.msk.bf16.mxu0 %vm92_vm1, %v52_v26  ;;  %709 = vmatpush3.bf16.msra.mxu1 %v773_v27 }
  0x2a   :  { %710 = vmatprep.subr.bf16.mxu1 %v774_v30  ;;  %739 = vmatpush3.bf16.msra.mxu0 %v780_v37 }
  0x2b   :  { %740 = vmatprep.subr.bf16.mxu0 %v781_v38 }
  0x2d   :  { %711 = vmatpush3.bf16.msra.mxu1 %v774_v30 }
  0x2e   :  { %712 = vmatprep.subr.bf16.mxu1 %v775_v32  ;;  %741 = vmatpush3.bf16.msra.mxu0 %v781_v38 }
  0x2f   :  { %742 = vmatprep.subr.bf16.mxu0 %v782_v39 }
  0x30   :  { %697 = vmatmul.mubr.msk.bf16.gmra.mrb[12].mxu0 %vm92_vm1, %v53_v31 }
  0x31   :  { %713 = vmatpush3.bf16.msra.mxu1 %v775_v32 }
  0x32   :  { %714 = vmatprep.subr.bf16.mxu1 %v776_v33  ;;  %743 = vmatpush3.bf16.msra.mxu0 %v782_v39 }
  0x35   :  { %715 = vmatpush3.bf16.msra.mxu1 %v776_v33  ;;  %v783_v33 = vld [vmem:[#allocation2 + $0x74] sm:$0xff]  }
  0x36   :  { %744 = vmatprep.subr.bf16.mxu0 %v783_v33 }
  0x37   :  { %745 = vmatpush3.bf16.msra.mxu0 %v783_v33 }
  0x38   :  { %746 = vmatprep.subr.bf16.mxu0 %v784_v34 }
  0x3b   :  { %747 = vmatpush3.bf16.msra.mxu0 %v784_v34 }
  0xeb   :  { %v686_v41 = vpop.f32.mrb[0].mxu0 }
  0xec   :  { %v164_v42 = vadd.f32 %v686_v41, %v614_v40  ;;  %v155_v43 = vpop.f32.mrb[1].mxu0 }
  0xed   :  { %v156_v44 = vadd.f32 %v614_v40, %v155_v43  ;;  %v687_v45 = vpop.f32.mrb[2].mxu0 }
  0xee   :  { %v167_v46 = vadd.f32 %v687_v45, %v614_v40  ;;  %v158_v47 = vpop.f32.mrb[3].mxu0  ;;  %v220_v49 = vmax.f32 %v164_v42, 0.0 }
  0xef   :  { %v159_v48 = vadd.f32 %v614_v40, %v158_v47  ;;  %v218_v51 = vmax.f32 %v156_v44, 0.0 }
  0xf0   :  { %v221_v50 = vmax.f32 %v167_v46, 0.0 }
  0xf1   :  { %v219_v52 = vmax.f32 %v159_v48, 0.0 }
  0xf2   :  { %v235_v53 = vpack.c.bf16 %v221_v50, %v220_v49 }
  0xf3   :  { %v690_v54 = vpop.f32.mrb[4].mxu0  ;;  %v234_v55 = vpack.c.bf16 %v219_v52, %v218_v51 }
  0xf4   :  { %v180_v56 = vadd.f32 %v690_v54, %v614_v40  ;;  %v171_v57 = vpop.f32.mrb[5].mxu0 }
  0xf5   :  { %v172_v58 = vadd.f32 %v614_v40, %v171_v57  ;;  %v691_v59 = vpop.f32.mrb[6].mxu0  ;;  %716 = vmatprep.mubr.bf16.mxu1 %v234_v55 }
  0xf6   :  { %v224_v60 = vmax.f32 %v180_v56, 0.0  ;;  %v183_v61 = vadd.f32 %v691_v59, %v614_v40  ;;  %v174_v62 = vpop.f32.mrb[7].mxu0  ;;  %717 = vmatmul.mubr.bf16.vlgmr.msra.gmra.mrb[0].mxu1 %v235_v53 }
  0xf7   :  { %v222_v63 = vmax.f32 %v172_v58, 0.0  ;;  %v175_v0 = vadd.f32 %v614_v40, %v174_v62 }
  0xf8   :  { %v225_v1 = vmax.f32 %v183_v61, 0.0 }
  0xf9   :  { %v223_v2 = vmax.f32 %v175_v0, 0.0 }
  0xfa   :  { %v237_v3 = vpack.c.bf16 %v225_v1, %v224_v60 }
  0xfb   :  { %v236_v4 = vpack.c.bf16 %v223_v2, %v222_v63  ;;  %v694_v5 = vpop.f32.mrb[8].mxu0 }
  0xfc   :  { %v196_v6 = vadd.f32 %v694_v5, %v614_v40  ;;  %v187_v7 = vpop.f32.mrb[9].mxu0 }
  0xfd   :  { %720 = vmatprep.mubr.bf16.mxu1 %v236_v4  ;;  %v188_v8 = vadd.f32 %v614_v40, %v187_v7  ;;  %v695_v9 = vpop.f32.mrb[10].mxu0 }
  0xfe   :  { %721 = vmatmul.mubr.bf16.gmra.mrb[4].mxu1 %v237_v3  ;;  %v228_v10 = vmax.f32 %v196_v6, 0.0  ;;  %v199_v11 = vadd.f32 %v695_v9, %v614_v40  ;;  %v190_v12 = vpop.f32.mrb[11].mxu0 }
  0xff   :  { %v226_v13 = vmax.f32 %v188_v8, 0.0  ;;  %v191_v14 = vadd.f32 %v614_v40, %v190_v12 }
 0x100   :  { %v229_v15 = vmax.f32 %v199_v11, 0.0 }
 0x101   :  { %v227_v16 = vmax.f32 %v191_v14, 0.0 }
 0x102   :  { %v239_v17 = vpack.c.bf16 %v229_v15, %v228_v10 }
 0x103   :  { %v238_v18 = vpack.c.bf16 %v227_v16, %v226_v13  ;;  %v698_v19 = vpop.f32.mrb[12].mxu0 }
 0x104   :  { %v212_v20 = vadd.f32 %v698_v19, %v614_v40  ;;  %v203_v21 = vpop.f32.mrb[13].mxu0 }
 0x105   :  { %724 = vmatprep.mubr.bf16.mxu1 %v238_v18  ;;  %v204_v22 = vadd.f32 %v614_v40, %v203_v21  ;;  %v699_v23 = vpop.f32.mrb[14].mxu0 }
 0x106   :  { %725 = vmatmul.mubr.bf16.gmra.mrb[8].mxu1 %v239_v17  ;;  %v232_v24 = vmax.f32 %v212_v20, 0.0  ;;  %v215_v25 = vadd.f32 %v699_v23, %v614_v40  ;;  %v206_v26 = vpop.f32.mrb[15].mxu0 }
 0x107   :  { %v230_v27 = vmax.f32 %v204_v22, 0.0  ;;  %v207_v28 = vadd.f32 %v614_v40, %v206_v26 }
 0x108   :  { %v233_v29 = vmax.f32 %v215_v25, 0.0 }
 0x109   :  { %v231_v30 = vmax.f32 %v207_v28, 0.0  ;;  %v632_v28 = vld [vmem:[%s948_s2 + $0x2] ss:$0 sm:$0xff]  ;;  %s836_s2 = smov [#allocation5]  }
 0x10a   :  { %v241_v31 = vpack.c.bf16 %v233_v29, %v232_v24  ;;  %s605_s7 = sshll.u32 %s836_s2, 4  ;;  %s606_s7 = int_to_ptr.vmem [resolvable:$true] %s605_s7 }
 0x10b   :  { %v240_v32 = vpack.c.bf16 %v231_v30, %v230_v27  ;;  %s807_s8 = scalar_lea.vmem %s606_s7, 32  ;;  %p812_p9 = scmp.lt.s32.totalorder %s606_s7, %s606_s7 }
 0x10c   :  { %p808_p8 = scmp.ne.s32.totalorder %s606_s7, %s807_s8  ;;  %p813_p10 = scmp.lt.s32.totalorder %s807_s8, %s807_s8 }
 0x10d   :  { %728 = vmatprep.mubr.bf16.mxu1 %v240_v32 }
 0x10e   :  { %729 = vmatmul.mubr.bf16.gmra.mrb[12].mxu1 %v241_v31  ;;  %p814_p11 = por %p813_p10, %p812_p9 }
 0x110   :  { %p815_p12 = pnand %p814_p11, %p808_p8 }
 0x1c9   :  { %v718_v36 = vpop.f32.mrb[0].mxu1 }
 0x1ca   :  { %v338_v37 = vadd.f32 %v718_v36, %v623_v35  ;;  %v329_v38 = vpop.f32.mrb[1].mxu1 }
 0x1cb   :  { %v330_v39 = vadd.f32 %v623_v35, %v329_v38  ;;  %v719_v40 = vpop.f32.mrb[2].mxu1 }
 0x1cc   :  { %v341_v41 = vadd.f32 %v719_v40, %v623_v35  ;;  %v332_v42 = vpop.f32.mrb[3].mxu1  ;;  %v394_v44 = vmax.f32 %v338_v37, 0.0 }
 0x1cd   :  { %v333_v43 = vadd.f32 %v623_v35, %v332_v42  ;;  %v392_v46 = vmax.f32 %v330_v39, 0.0 }
 0x1ce   :  { %v395_v45 = vmax.f32 %v341_v41, 0.0 }
 0x1cf   :  { %v393_v47 = vmax.f32 %v333_v43, 0.0 }
 0x1d0   :  { %v409_v48 = vpack.c.bf16 %v395_v45, %v394_v44 }
 0x1d1   :  { %v408_v49 = vpack.c.bf16 %v393_v47, %v392_v46  ;;  %v722_v50 = vpop.f32.mrb[4].mxu1 }
 0x1d2   :  { %v354_v51 = vadd.f32 %v722_v50, %v623_v35  ;;  %v345_v52 = vpop.f32.mrb[5].mxu1 }
 0x1d3   :  { %v346_v53 = vadd.f32 %v623_v35, %v345_v52  ;;  %v723_v54 = vpop.f32.mrb[6].mxu1  ;;  %748 = vmatprep.mubr.bf16.mxu0 %v408_v49 }
 0x1d4   :  { %v398_v55 = vmax.f32 %v354_v51, 0.0  ;;  %v357_v56 = vadd.f32 %v723_v54, %v623_v35  ;;  %v348_v57 = vpop.f32.mrb[7].mxu1  ;;  %749 = vmatmul.mubr.bf16.vlgmr.msra.gmra.mrb[16].mxu0 %v409_v48 }
 0x1d5   :  { %v396_v58 = vmax.f32 %v346_v53, 0.0  ;;  %v349_v59 = vadd.f32 %v623_v35, %v348_v57 }
 0x1d6   :  { %v399_v60 = vmax.f32 %v357_v56, 0.0 }
 0x1d7   :  { %v397_v61 = vmax.f32 %v349_v59, 0.0 }
 0x1d8   :  { %v411_v62 = vpack.c.bf16 %v399_v60, %v398_v55 }
 0x1d9   :  { %v410_v63 = vpack.c.bf16 %v397_v61, %v396_v58  ;;  %v726_v0 = vpop.f32.mrb[8].mxu1 }
 0x1da   :  { %v370_v1 = vadd.f32 %v726_v0, %v623_v35  ;;  %v361_v2 = vpop.f32.mrb[9].mxu1 }
 0x1db   :  { %752 = vmatprep.mubr.bf16.mxu0 %v410_v63  ;;  %v362_v3 = vadd.f32 %v623_v35, %v361_v2  ;;  %v727_v4 = vpop.f32.mrb[10].mxu1 }
 0x1dc   :  { %753 = vmatmul.mubr.bf16.gmra.mrb[20].mxu0 %v411_v62  ;;  %v402_v5 = vmax.f32 %v370_v1, 0.0  ;;  %v373_v6 = vadd.f32 %v727_v4, %v623_v35  ;;  %v364_v7 = vpop.f32.mrb[11].mxu1 }
 0x1dd   :  { %v400_v8 = vmax.f32 %v362_v3, 0.0  ;;  %v365_v9 = vadd.f32 %v623_v35, %v364_v7 }
 0x1de   :  { %v403_v10 = vmax.f32 %v373_v6, 0.0 }
 0x1df   :  { %v401_v11 = vmax.f32 %v365_v9, 0.0 }
 0x1e0   :  { %v413_v12 = vpack.c.bf16 %v403_v10, %v402_v5 }
 0x1e1   :  { %v412_v13 = vpack.c.bf16 %v401_v11, %v400_v8  ;;  %v730_v14 = vpop.f32.mrb[12].mxu1 }
 0x1e2   :  { %v386_v15 = vadd.f32 %v730_v14, %v623_v35  ;;  %v377_v16 = vpop.f32.mrb[13].mxu1 }
 0x1e3   :  { %756 = vmatprep.mubr.bf16.mxu0 %v412_v13  ;;  %v378_v17 = vadd.f32 %v623_v35, %v377_v16  ;;  %v731_v18 = vpop.f32.mrb[14].mxu1 }
 0x1e4   :  { %757 = vmatmul.mubr.bf16.gmra.mrb[24].mxu0 %v413_v12  ;;  %v406_v19 = vmax.f32 %v386_v15, 0.0  ;;  %v389_v20 = vadd.f32 %v731_v18, %v623_v35  ;;  %v380_v21 = vpop.f32.mrb[15].mxu1 }
 0x1e5   :  { %v404_v22 = vmax.f32 %v378_v17, 0.0  ;;  %v381_v23 = vadd.f32 %v623_v35, %v380_v21 }
 0x1e6   :  { %v407_v24 = vmax.f32 %v389_v20, 0.0 }
 0x1e7   :  { %v405_v25 = vmax.f32 %v381_v23, 0.0 }
 0x1e8   :  { %v415_v26 = vpack.c.bf16 %v407_v24, %v406_v19 }
 0x1e9   :  { %v414_v27 = vpack.c.bf16 %v405_v25, %v404_v22 }
 0x1eb   :  { %760 = vmatprep.mubr.bf16.mxu0 %v414_v27 }
 0x1ec   :  { %761 = vmatmul.mubr.bf16.gmra.mrb[28].mxu0 %v415_v26 }
 0x2a7   :  { %v750_v29 = vpop.f32.mrb[16].mxu0 }
 0x2a8   :  { %v503_v30 = vpop.f32.mrb[17].mxu0  ;;  %v512_v37 = vadd.f32 %v750_v29, %v632_v28 }
 0x2a9   :  { %v751_v31 = vpop.f32.mrb[18].mxu0  ;;  %v504_v32 = vadd.f32 %v632_v28, %v503_v30 }
 0x2aa   :  { %v506_v33 = vpop.f32.mrb[19].mxu0  ;;  %v515_v40 = vadd.f32 %v751_v31, %v632_v28 }
 0x2ab   :  { %566 = vxpose.xlu0.b32.start [1/16] (narrow) %v504_v32, 8  ;;  %v507_v34 = vadd.f32 %v632_v28, %v506_v33 }
 0x2af   :  { %v754_v36 = vpop.f32.mrb[20].mxu0  ;;  %567 = vxpose.xlu0.b32.cont [2/16] (narrow) %v507_v34, 8 }
 0x2b0   :  { %v519_v35 = vpop.f32.mrb[21].mxu0  ;;  %v528_v49 = vadd.f32 %v754_v36, %v632_v28 }
 0x2b1   :  { %v755_v38 = vpop.f32.mrb[22].mxu0  ;;  %v520_v43 = vadd.f32 %v632_v28, %v519_v35 }
 0x2b2   :  { %v522_v39 = vpop.f32.mrb[23].mxu0  ;;  %v531_v52 = vadd.f32 %v755_v38, %v632_v28 }
 0x2b3   :  { %568 = vxpose.xlu0.b32.cont [3/16] (narrow) %v512_v37, 8  ;;  %v523_v46 = vadd.f32 %v632_v28, %v522_v39 }
 0x2b7   :  { %569 = vxpose.xlu0.b32.cont [4/16] (narrow) %v515_v40, 8  ;;  %v758_v41 = vpop.f32.mrb[24].mxu0 }
 0x2b8   :  { %v535_v42 = vpop.f32.mrb[25].mxu0  ;;  %v544_v55 = vadd.f32 %v758_v41, %v632_v28 }
 0x2b9   :  { %v759_v44 = vpop.f32.mrb[26].mxu0  ;;  %v536_v53 = vadd.f32 %v632_v28, %v535_v42 }
 0x2ba   :  { %v538_v45 = vpop.f32.mrb[27].mxu0  ;;  %v547_v56 = vadd.f32 %v759_v44, %v632_v28 }
 0x2bb   :  { %570 = vxpose.xlu0.b32.cont [5/16] (narrow) %v520_v43, 8  ;;  %v539_v54 = vadd.f32 %v632_v28, %v538_v45 }
 0x2bf   :  { %571 = vxpose.xlu0.b32.cont [6/16] (narrow) %v523_v46, 8  ;;  %v762_v47 = vpop.f32.mrb[28].mxu0 }
 0x2c0   :  { %v551_v48 = vpop.f32.mrb[29].mxu0  ;;  %v560_v59 = vadd.f32 %v762_v47, %v632_v28 }
 0x2c1   :  { %v763_v50 = vpop.f32.mrb[30].mxu0  ;;  %v552_v57 = vadd.f32 %v632_v28, %v551_v48 }
 0x2c2   :  { %v554_v51 = vpop.f32.mrb[31].mxu0  ;;  %v563_v60 = vadd.f32 %v763_v50, %v632_v28 }
 0x2c3   :  { %572 = vxpose.xlu0.b32.cont [7/16] (narrow) %v528_v49, 8  ;;  %v555_v58 = vadd.f32 %v632_v28, %v554_v51 }
 0x2c7   :  { %573 = vxpose.xlu0.b32.cont [8/16] (narrow) %v531_v52, 8 }
 0x2cb   :  { %574 = vxpose.xlu0.b32.cont [9/16] (narrow) %v536_v53, 8 }
 0x2cf   :  { %575 = vxpose.xlu0.b32.cont [10/16] (narrow) %v539_v54, 8 }
 0x2d3   :  { %576 = vxpose.xlu0.b32.cont [11/16] (narrow) %v544_v55, 8 }
 0x2d7   :  { %577 = vxpose.xlu0.b32.cont [12/16] (narrow) %v547_v56, 8 }
 0x2db   :  { %578 = vxpose.xlu0.b32.cont [13/16] (narrow) %v552_v57, 8 }
 0x2df   :  { %579 = vxpose.xlu0.b32.cont [14/16] (narrow) %v555_v58, 8 }
 0x2e3   :  { %580 = vxpose.xlu0.b32.cont [15/16] (narrow) %v560_v59, 8 }
 0x2e7   :  { %581 = vxpose.xlu0.b32.end [16/16] (narrow) %v563_v60, 8 }
 0x32b   :  { %v582_v61 = vpop.trf.xlu0 }
 0x32c   :  { %598 = vst [vmem:[#allocation5] sm:$0x3] %v582_v61 }
 0x32d   :  { %818 = shalt.err (!%p815_p12)
}
 0x32e   :  { %s819_s11 = scalar_lea.hbm %s949_s3, 32 }
 0x32f   :  { %p820_p13 = scmp.ne.s32.totalorder %s949_s3, %s819_s11  ;;  %p823_p0 = scmp.lt.u32.totalorder %s819_s11, %s949_s3 }
 0x331   :  { %p825_p1 = pnand %p823_p0, %p820_p13 }
 0x333   :  { %828 = shalt.err (!%p825_p1)
}
 0x334   :  { %608 = dma.vmem_to_hbm [thread:$0]  %s606_s7, 32, %s949_s3, [#allocation4]  }
 0x335   :  { %831 = dma.done.wait [#allocation4], 32  }
 0x336   :  { %832 = vsyncadd [#allocation4], 4294967264 }
 0x337   :  { %612 = vsyncpa [#allocation3], 1 }
 0x338   :  { %613 = vsyncpa [#allocation4], 1 }

</bundles_post_ra>
